<compile_context>
chip_gen: v7x
topology: tpu7x:2x2x1
jax: 0.10.0
libtpu: 0.0.40
codegen_flags: <defaults>
</compile_context>

<pallas_src>
import jax
import jax.numpy as jnp
from jax.experimental import pallas as pl
from jax.experimental.pallas import tpu as pltpu


def _value_net_kernel(x_ref,
                      w1_ref, b1_ref,
                      w2_ref, b2_ref,
                      w3_ref, b3_ref,
                      w4_ref, b4_ref,
                      o_ref):
    """Fused 4-layer MLP forward on one batch tile. All operands live in VMEM.

    x / w1..w3 are bf16 (MXU-native); accumulation, bias add and ReLU are f32.
    """
    x = x_ref[...]                                              # (Bt, D) bf16

    # Layer 1: (Bt, D) @ (D, H) + (1, H) -> ReLU   (K=16 stays on the MXU)
    h = jnp.dot(x, w1_ref[...], preferred_element_type=jnp.float32) + b1_ref[...]
    h = jnp.maximum(h, 0.0)

    # Layer 2: (Bt, H) @ (H, H) + (1, H) -> ReLU
    h = jnp.dot(h.astype(jnp.bfloat16), w2_ref[...],
                preferred_element_type=jnp.float32) + b2_ref[...]
    h = jnp.maximum(h, 0.0)

    # Layer 3: (Bt, H) @ (H, H/2) + (1, H/2) -> ReLU
    h = jnp.dot(h.astype(jnp.bfloat16), w3_ref[...],
                preferred_element_type=jnp.float32) + b3_ref[...]
    h = jnp.maximum(h, 0.0)

    # Layer 4: (Bt, H/2) x (H/2, 1).  A 1-column matmul wastes a full MXU pass,
    # so do a VPU multiply + XLU lane-reduce.  w4 is pre-transposed host-side
    # to (1, H/2), so this is lane-aligned with no in-kernel relayout.
    v = jnp.sum(h * w4_ref[...], axis=-1, keepdims=True) + b4_ref[...]

    o_ref[...] = v.astype(o_ref.dtype)


def _round_up(n, m):
    return ((n + m - 1) // m) * m


def prepare_params(params, *, d_pad=None):
    """Convert f32 (in, out)/(1, out) params to the kernel layout.

    * Hidden widths zero-padded to multiples of 128 (lane-dense activations);
      semantics-preserving because padded columns get zero weight AND zero
      bias, ReLU(0)=0, and the next layer's padded input rows are zero.
    * w1..w3 cast to bfloat16 (MXU operands); accumulation stays f32 in-kernel.
    * w4 pre-transposed to (1, H//2) so layer 4 needs no per-step relayout.
    * Optionally pads w1's input rows to d_pad (wrapper pads x cols to match).
    """
    d = params["w1"].shape[0]
    d_pad = d if d_pad is None else d_pad
    h1 = params["w1"].shape[1]
    h2 = params["w2"].shape[1]
    h3 = params["w3"].shape[1]
    h1p, h2p, h3p = _round_up(h1, 128), _round_up(h2, 128), _round_up(h3, 128)

    p = {}
    p["w1"] = jnp.pad(params["w1"],
                      ((0, d_pad - d), (0, h1p - h1))).astype(jnp.bfloat16)
    p["b1"] = jnp.pad(params["b1"], ((0, 0), (0, h1p - h1)))
    p["w2"] = jnp.pad(params["w2"],
                      ((0, h1p - h1), (0, h2p - h2))).astype(jnp.bfloat16)
    p["b2"] = jnp.pad(params["b2"], ((0, 0), (0, h2p - h2)))
    p["w3"] = jnp.pad(params["w3"],
                      ((0, h2p - h2), (0, h3p - h3))).astype(jnp.bfloat16)
    p["b3"] = jnp.pad(params["b3"], ((0, 0), (0, h3p - h3)))
    p["w4"] = jnp.pad(params["w4"].T, ((0, 0), (0, h3p - h3)))   # (1, H3p) f32
    p["b4"] = params["b4"]                                        # (1, 1)  f32
    return p


def value_network_forward(x, params, *, b_tile=1024):
    """Batch-tiled fused Pallas forward.

    Args:
      x: (batch, input_dim) float32
      params: dict w1..w4 as (in, out), b1..b4 as (1, out), all float32
      b_tile: rows per grid step.  Prefer the fewest big steps on single-TC
        v5e/v6e; keep >= 2 steps on v7x so the "parallel" axis splits across
        its 2 TensorCores.
    Returns:
      (batch, 1) float32 value estimates.
    """
    B, D = x.shape

    # Pad the feature dim to a lane multiple only when it is large AND
    # misaligned; blindly padding a tiny D (e.g. 16) would inflate x DMA 8x.
    d_pad = _round_up(D, 128) if D > 128 else D
    p = prepare_params(params, d_pad=d_pad)
    H1, H2, H3 = p["w1"].shape[1], p["w2"].shape[1], p["w3"].shape[1]

    # Clamp the tile to the (rounded-up) batch and keep it sublane-friendly
    # for bf16 (multiple of 16).  Padded (zero) rows are sliced off below.
    b_tile = _round_up(max(16, min(b_tile, B)), 16)
    n_tiles = pl.cdiv(B, b_tile)
    B_pad = n_tiles * b_tile
    if (B_pad != B) or (d_pad != D):
        x = jnp.pad(x, ((0, B_pad - B), (0, d_pad - D)))
    x = x.astype(jnp.bfloat16)   # bf16 x halves the only per-step HBM read

    def resident(arr):
        # Full-array block with a constant index map: DMA'd once, stays in
        # VMEM across all grid steps.
        # TODO(synk): pipeline_mode=pl.Buffered(1) would drop the redundant
        # second buffer for these constant operands, but the whole resident
        # set is <0.5 MiB here so the VMEM saving is negligible.
        return pl.BlockSpec(arr.shape, lambda i: (0, 0))

    in_specs = [
        pl.BlockSpec((b_tile, d_pad), lambda i: (i, 0)),   # x: tiled over batch
        resident(p["w1"]), resident(p["b1"]),
        resident(p["w2"]), resident(p["b2"]),
        resident(p["w3"]), resident(p["b3"]),
        resident(p["w4"]), resident(p["b4"]),
    ]
    # (b_tile, 1) output block: lane width 1 means masked stores, but the whole
    # output is only ~4 KiB/step; a lane-dense repack is not worth an extra
    # relayout at these sizes (profile-guided change if it ever shows up).
    out_spec = pl.BlockSpec((b_tile, 1), lambda i: (i, 0))

    # Advisory cost hint so XLA schedules surrounding ops around the call.
    flops = 2 * B_pad * (d_pad * H1 + H1 * H2 + H2 * H3 + H3)
    param_bytes = sum(int(v.size) * v.dtype.itemsize for v in p.values())
    bytes_accessed = (int(x.size) * x.dtype.itemsize + param_bytes + B_pad * 4)
    cost = pl.CostEstimate(flops=flops, transcendentals=0,
                           bytes_accessed=bytes_accessed)

    # Only bump the scoped-VMEM limit when a very large f32-ish tile would push
    # past v5e's conservative 16 MiB default (footprint here is a few MiB).
    act_bytes = 3 * b_tile * max(H1, H2, H3) * 4
    vmem_est = 2 * (b_tile * d_pad * 2 + b_tile * 4) + param_bytes + act_bytes
    vmem_limit = None
    if vmem_est > 12 * 1024 * 1024:
        vmem_limit = min(int(vmem_est * 3 // 2), 64 * 1024 * 1024)

    out = pl.pallas_call(
        _value_net_kernel,
        out_shape=jax.ShapeDtypeStruct((B_pad, 1), jnp.float32),
        grid=(n_tiles,),
        in_specs=in_specs,
        out_specs=out_spec,
        compiler_params=pltpu.CompilerParams(
            dimension_semantics=("parallel",),
            vmem_limit_bytes=vmem_limit),
        cost_estimate=cost,
    )(x,
      p["w1"], p["b1"],
      p["w2"], p["b2"],
      p["w3"], p["b3"],
      p["w4"], p["b4"])

    return out[:B]


def init_params(key, input_dim, hidden_dim=256):
    """Deterministic init mirroring nn.Linear's U(-1/sqrt(fan_in), 1/sqrt(fan_in)).

    Note: a torch state_dict has .weight as (out, in) and bias as (out,); this
    layout is the transpose, with biases reshaped to (1, out).
    """
    dims = [(input_dim, hidden_dim),
            (hidden_dim, hidden_dim),
            (hidden_dim, hidden_dim // 2),
            (hidden_dim // 2, 1)]
    params = {}
    for i, (fan_in, fan_out) in enumerate(dims, start=1):
        key, kw, kb = jax.random.split(key, 3)
        bound = 1.0 / float(fan_in) ** 0.5
        params[f"w{i}"] = jax.random.uniform(
            kw, (fan_in, fan_out), jnp.float32, -bound, bound)
        params[f"b{i}"] = jax.random.uniform(
            kb, (1, fan_out), jnp.float32, -bound, bound)
    return params


def _reference_forward(x, p):
    """Plain-JAX f32 reference for correctness checking."""
    h = jnp.maximum(x @ p["w1"] + p["b1"], 0.0)
    h = jnp.maximum(h @ p["w2"] + p["b2"], 0.0)
    h = jnp.maximum(h @ p["w3"] + p["b3"], 0.0)
    return h @ p["w4"] + p["b4"]


if __name__ == "__main__":
    key = jax.random.PRNGKey(0)
    batch, input_dim, hidden_dim = 200, 16, 256   # small demo; module default H

    key, kx = jax.random.split(key)
    x = jax.random.normal(kx, (batch, input_dim), jnp.float32)
    params = init_params(key, input_dim, hidden_dim)

    # b_tile=128 -> 2 grid steps (keeps both v7x TCs busy); the padded tail of
    # the 200-row batch is sliced off inside the wrapper.
    out = value_network_forward(x, params, b_tile=128)
    out = jax.block_until_ready(out)

    ref = _reference_forward(x, params)
    assert out.shape == (batch, 1), out.shape
    # bf16 MXU operands with f32 accumulation: parity tolerance is loosened
    # relative to the pure-f32 path.
    max_err = float(jnp.max(jnp.abs(out - ref)))
    assert jnp.allclose(out, ref, atol=3e-2, rtol=3e-2), max_err

    print("KERNEL_OK")
</pallas_src>

<mosaic_0001>
module attributes {stable_mosaic.version = 11 : i64} {
  func.func @_value_net_kernel(%arg0: i32, %arg1: memref<128x16xbf16, #tpu.memory_space<vmem>>, %arg2: memref<16x256xbf16, #tpu.memory_space<vmem>>, %arg3: memref<1x256xf32, #tpu.memory_space<vmem>>, %arg4: memref<256x256xbf16, #tpu.memory_space<vmem>>, %arg5: memref<1x256xf32, #tpu.memory_space<vmem>>, %arg6: memref<256x128xbf16, #tpu.memory_space<vmem>>, %arg7: memref<1x128xf32, #tpu.memory_space<vmem>>, %arg8: memref<1x128xf32, #tpu.memory_space<vmem>>, %arg9: memref<1x1xf32, #tpu.memory_space<vmem>>, %arg10: memref<128x1xf32, #tpu.memory_space<vmem>>) attributes {dimension_semantics = [#tpu.dimension_semantics<parallel>], iteration_bounds = array<i64: 2>, scalar_prefetch = 0 : i64, scratch_operands = 0 : i64, tpu.core_type = #tpu.core_type<tc>, window_params = [{transform_indices = @transform_0, window_bounds = array<i64: 128, 16>}, {pipeline_mode = #tpu.pipeline_mode<synchronous>, transform_indices = @transform_1, window_bounds = array<i64: 16, 256>}, {pipeline_mode = #tpu.pipeline_mode<synchronous>, transform_indices = @transform_2, window_bounds = array<i64: 1, 256>}, {pipeline_mode = #tpu.pipeline_mode<synchronous>, transform_indices = @transform_3, window_bounds = array<i64: 256, 256>}, {pipeline_mode = #tpu.pipeline_mode<synchronous>, transform_indices = @transform_4, window_bounds = array<i64: 1, 256>}, {pipeline_mode = #tpu.pipeline_mode<synchronous>, transform_indices = @transform_5, window_bounds = array<i64: 256, 128>}, {pipeline_mode = #tpu.pipeline_mode<synchronous>, transform_indices = @transform_6, window_bounds = array<i64: 1, 128>}, {pipeline_mode = #tpu.pipeline_mode<synchronous>, transform_indices = @transform_7, window_bounds = array<i64: 1, 128>}, {pipeline_mode = #tpu.pipeline_mode<synchronous>, transform_indices = @transform_8, window_bounds = array<i64: 1, 1>}, {transform_indices = @transform_9, window_bounds = array<i64: 128, 1>}]} {
    %c0 = arith.constant 0 : index
    %c0_0 = arith.constant 0 : index
    %0 = vector.load %arg1[%c0, %c0_0] : memref<128x16xbf16, #tpu.memory_space<vmem>>, vector<128x16xbf16>
    %c0_1 = arith.constant 0 : index
    %c0_2 = arith.constant 0 : index
    %1 = vector.load %arg2[%c0_1, %c0_2] : memref<16x256xbf16, #tpu.memory_space<vmem>>, vector<16x256xbf16>
    %cst = arith.constant dense<0.000000e+00> : vector<128x256xf32>
    %2 = tpu.matmul %0, %1, %cst {dimension_numbers = #tpu.dot_dimension_numbers<[1], [0], [0], [1], [0, 0, 1, 1], [], []>} : vector<128x16xbf16>, vector<16x256xbf16>, vector<128x256xf32> -> vector<128x256xf32>
    %c0_3 = arith.constant 0 : index
    %c0_4 = arith.constant 0 : index
    %3 = vector.load %arg3[%c0_3, %c0_4] : memref<1x256xf32, #tpu.memory_space<vmem>>, vector<1x256xf32>
    %4 = vector.broadcast %3 : vector<1x256xf32> to vector<128x256xf32>
    %5 = arith.addf %2, %4 : vector<128x256xf32>
    %cst_5 = arith.constant 0.000000e+00 : f32
    %6 = vector.broadcast %cst_5 : f32 to vector<128x256xf32>
    %7 = arith.maximumf %5, %6 : vector<128x256xf32>
    %8 = arith.truncf %7 : vector<128x256xf32> to vector<128x256xbf16>
    %c0_6 = arith.constant 0 : index
    %c0_7 = arith.constant 0 : index
    %9 = vector.load %arg4[%c0_6, %c0_7] : memref<256x256xbf16, #tpu.memory_space<vmem>>, vector<256x256xbf16>
    %cst_8 = arith.constant dense<0.000000e+00> : vector<128x256xf32>
    %10 = tpu.matmul %8, %9, %cst_8 {dimension_numbers = #tpu.dot_dimension_numbers<[1], [0], [0], [1], [0, 0, 1, 1], [], []>} : vector<128x256xbf16>, vector<256x256xbf16>, vector<128x256xf32> -> vector<128x256xf32>
    %c0_9 = arith.constant 0 : index
    %c0_10 = arith.constant 0 : index
    %11 = vector.load %arg5[%c0_9, %c0_10] : memref<1x256xf32, #tpu.memory_space<vmem>>, vector<1x256xf32>
    %12 = vector.broadcast %11 : vector<1x256xf32> to vector<128x256xf32>
    %13 = arith.addf %10, %12 : vector<128x256xf32>
    %cst_11 = arith.constant 0.000000e+00 : f32
    %14 = vector.broadcast %cst_11 : f32 to vector<128x256xf32>
    %15 = arith.maximumf %13, %14 : vector<128x256xf32>
    %16 = arith.truncf %15 : vector<128x256xf32> to vector<128x256xbf16>
    %c0_12 = arith.constant 0 : index
    %c0_13 = arith.constant 0 : index
    %17 = vector.load %arg6[%c0_12, %c0_13] : memref<256x128xbf16, #tpu.memory_space<vmem>>, vector<256x128xbf16>
    %cst_14 = arith.constant dense<0.000000e+00> : vector<128x128xf32>
    %18 = tpu.matmul %16, %17, %cst_14 {dimension_numbers = #tpu.dot_dimension_numbers<[1], [0], [0], [1], [0, 0, 1, 1], [], []>} : vector<128x256xbf16>, vector<256x128xbf16>, vector<128x128xf32> -> vector<128x128xf32>
    %c0_15 = arith.constant 0 : index
    %c0_16 = arith.constant 0 : index
    %19 = vector.load %arg7[%c0_15, %c0_16] : memref<1x128xf32, #tpu.memory_space<vmem>>, vector<1x128xf32>
    %20 = vector.broadcast %19 : vector<1x128xf32> to vector<128x128xf32>
    %21 = arith.addf %18, %20 : vector<128x128xf32>
    %cst_17 = arith.constant 0.000000e+00 : f32
    %22 = vector.broadcast %cst_17 : f32 to vector<128x128xf32>
    %23 = arith.maximumf %21, %22 : vector<128x128xf32>
    %c0_18 = arith.constant 0 : index
    %c0_19 = arith.constant 0 : index
    %24 = vector.load %arg8[%c0_18, %c0_19] : memref<1x128xf32, #tpu.memory_space<vmem>>, vector<1x128xf32>
    %25 = vector.broadcast %24 : vector<1x128xf32> to vector<128x128xf32>
    %26 = arith.mulf %23, %25 : vector<128x128xf32>
    %cst_20 = arith.constant dense<0.000000e+00> : vector<128xf32>
    %27 = vector.multi_reduction <add>, %26, %cst_20 [1] : vector<128x128xf32> to vector<128xf32>
    %28 = vector.shape_cast %27 : vector<128xf32> to vector<128x1xf32>
    %c0_21 = arith.constant 0 : index
    %c0_22 = arith.constant 0 : index
    %29 = vector.load %arg9[%c0_21, %c0_22] : memref<1x1xf32, #tpu.memory_space<vmem>>, vector<1x1xf32>
    %30 = vector.broadcast %29 : vector<1x1xf32> to vector<128x1xf32>
    %31 = arith.addf %28, %30 : vector<128x1xf32>
    %c0_23 = arith.constant 0 : index
    %c0_24 = arith.constant 0 : index
    %32 = vector.load %arg10[%c0_23, %c0_24] : memref<128x1xf32, #tpu.memory_space<vmem>>, vector<128x1xf32>
    tpu.vector_store %arg10[%c0_23, %c0_24], %31 {strides = array<i32>} : memref<128x1xf32, #tpu.memory_space<vmem>>, vector<128x1xf32>,
    return
  }
  func.func @transform_0(%arg0: i32) -> (i32, i32) {
    %c0_i32 = arith.constant 0 : i32
    %c0_i32_0 = arith.constant 0 : i32
    return %arg0, %c0_i32 : i32, i32
  }
  func.func @transform_1(%arg0: i32) -> (i32, i32) {
    %c0_i32 = arith.constant 0 : i32
    %c0_i32_0 = arith.constant 0 : i32
    %c0_i32_1 = arith.constant 0 : i32
    return %c0_i32, %c0_i32_0 : i32, i32
  }
  func.func @transform_2(%arg0: i32) -> (i32, i32) {
    %c0_i32 = arith.constant 0 : i32
    %c0_i32_0 = arith.constant 0 : i32
    %c0_i32_1 = arith.constant 0 : i32
    return %c0_i32, %c0_i32_0 : i32, i32
  }
  func.func @transform_3(%arg0: i32) -> (i32, i32) {
    %c0_i32 = arith.constant 0 : i32
    %c0_i32_0 = arith.constant 0 : i32
    %c0_i32_1 = arith.constant 0 : i32
    return %c0_i32, %c0_i32_0 : i32, i32
  }
  func.func @transform_4(%arg0: i32) -> (i32, i32) {
    %c0_i32 = arith.constant 0 : i32
    %c0_i32_0 = arith.constant 0 : i32
    %c0_i32_1 = arith.constant 0 : i32
    return %c0_i32, %c0_i32_0 : i32, i32
  }
  func.func @transform_5(%arg0: i32) -> (i32, i32) {
    %c0_i32 = arith.constant 0 : i32
    %c0_i32_0 = arith.constant 0 : i32
    %c0_i32_1 = arith.constant 0 : i32
    return %c0_i32, %c0_i32_0 : i32, i32
  }
  func.func @transform_6(%arg0: i32) -> (i32, i32) {
    %c0_i32 = arith.constant 0 : i32
    %c0_i32_0 = arith.constant 0 : i32
    %c0_i32_1 = arith.constant 0 : i32
    return %c0_i32, %c0_i32_0 : i32, i32
  }
  func.func @transform_7(%arg0: i32) -> (i32, i32) {
    %c0_i32 = arith.constant 0 : i32
    %c0_i32_0 = arith.constant 0 : i32
    %c0_i32_1 = arith.constant 0 : i32
    return %c0_i32, %c0_i32_0 : i32, i32
  }
  func.func @transform_8(%arg0: i32) -> (i32, i32) {
    %c0_i32 = arith.constant 0 : i32
    %c0_i32_0 = arith.constant 0 : i32
    %c0_i32_1 = arith.constant 0 : i32
    return %c0_i32, %c0_i32_0 : i32, i32
  }
  func.func @transform_9(%arg0: i32) -> (i32, i32) {
    %c0_i32 = arith.constant 0 : i32
    %c0_i32_0 = arith.constant 0 : i32
    return %arg0, %c0_i32 : i32, i32
  }
}

</mosaic_0001>

<bundles_post_ra>
// kernel: tpu_custom_call.1
= control target key start
LH: loop header
LB: loop body
LE: loop exit
PB: predicated region body
PF: predicated region fallthrough
CT: control target
= control target key end

     0   :  { %s2045_s0 = inlined_call_operand.vmem [shape: bf16[256,16], index: 0, kind: input, shape index: {}]   ;;  %s2046_s1 = inlined_call_operand.vmem [shape: bf16[16,256], index: 1, kind: input, shape index: {}]   ;;  %s2047_s2 = inlined_call_operand.vmem [shape: f32[1,256], index: 2, kind: input, shape index: {}]   ;;  %s2048_s3 = inlined_call_operand.hbm [shape: bf16[256,256], index: 3, kind: input, shape index: {}]   ;;  %s2049_s4 = inlined_call_operand.vmem [shape: f32[1,256], index: 4, kind: input, shape index: {}]   ;;  %s2050_s5 = inlined_call_operand.vmem [shape: bf16[256,128], index: 5, kind: input, shape index: {}]   ;;  %s2051_s6 = inlined_call_operand.vmem [shape: f32[1,128], index: 6, kind: input, shape index: {}]   ;;  %s2052_s7 = inlined_call_operand.vmem [shape: f32[1,128], index: 7, kind: input, shape index: {}]   ;;  %s2053_s8 = inlined_call_operand.<no memory space> [shape: f32[1,1], index: 8, kind: input, shape index: {}]   ;;  %s2054_s9 = inlined_call_operand.vmem [shape: f32[256,1], index: 9, kind: output, shape index: {}]  }
   0x1   :  { %v14_v0 = vstv %s2053_s8 }
   0x2   :  { %15 = vst [vmem:[#allocation2] sm:$0x1] %v14_v0 }
   0x3   :  { %16 = vsyncpa [#allocation4], 0  ;;  %s1736_s11 = smov 0  }
   0x4 LB: > { %s1396_s12 = sadd.s32 4294967295, %s1677_s11   ;;  %p1398_p0 = scmp.ge.s32.totalorder %s1677_s11, 1  ;;  %s1677_s11 = sphi %s1736_s11, %s22_s11  }
   0x5   : > { %p247_p1 = scmp.lt.s32.totalorder %s1677_s11, 3  ;;  %s1679_s13 = smov [#allocation3]  }
   0x6   : > { %s265_s14 = sshll.u32 %s1679_s13, 4  ;;  %p1750_p3 = scmp.eq.s32.totalorder %s1396_s12, 0  ;;  %s266_s14 = int_to_ptr.vmem [resolvable:$true] %s265_s14 }
   0x7   : > { %p1744_p2 = pnand %p1398_p0, %p247_p1  ;;  %s1639_s19 = scalar_lea.hbm %s2048_s3, 4096 }
   0x8   : > { %s2059_s15 = scalar_select %p1750_p3, 1, 0 }
   0x9   : > { %s2058_s8 = scalar_select %p1744_p2, 1, 0 }
   0xa   : > { %p1546_p4 = pneg %p1744_p2  ;;  %p1640_p6 = scmp.ne.s32.totalorder %s2048_s3, %s1639_s19 }
   0xb   : > { %p1646_p10 = scmp.lt.u32.totalorder %s1639_s19, %s2048_s3 }
   0xc   : > { %p1758_p5 = pnand %p1750_p3, %p1546_p4 }
   0xe   : > { %p1641_p7 = pneg %p1758_p5 }
  0x10   : > { %p1642_p8 = pnand %p1641_p7, %p1640_p6 }
  0x12   : > { %p1643_p9 = pneg %p1642_p8 }
  0x14   : > { %p1648_p11 = pnand %p1646_p10, %p1643_p9 }
  0x16   : > { %1651 = shalt.err (!%p1648_p11)
}
  0x17   : > { %s1652_s24 = scalar_lea.vmem %s266_s14, 4096  ;;  %p1660_p1 = scmp.lt.s32.totalorder %s266_s14, %s266_s14 }
  0x18   : > { %p1653_p12 = scmp.ne.s32.totalorder %s266_s14, %s1652_s24  ;;  %p1661_p4 = scmp.lt.s32.totalorder %s1652_s24, %s1652_s24 }
  0x1a   : > { %p1655_p13 = pnand %p1653_p12, %p1641_p7  ;;  %p1662_p3 = por %p1661_p4, %p1660_p1 }
  0x1c   : > { %p1656_p0 = pneg %p1655_p13 }
  0x1e   : > { %p1663_p2 = pnand %p1662_p3, %p1656_p0 }
  0x20   : > { %1666 = shalt.err (!%p1663_p2)
}
  0x21   : > { %s1680_s25 = smov 128   ;;  %s1681_s26 = smov 8  }
  0x22   : > { %1549 = dma.hbm_to_vmem [thread:$0]  (!%p1758_p5), %s2048_s3, 4096, %s266_s14, [#allocation4], %s1680_s25, %s1680_s25, %s1681_s26  }
  0x23   : > { %p2061_p6 = scmp.ne.s32.totalorder %s2058_s8, 0 }
  0x24   : > { %p2062_p8 = scmp.ne.s32.totalorder (!%p2061_p6), %s2059_s15, 0 }
  0x25   : > { %305 = sbr.rel (%p2061_p6) target bundleno = 920 (0x398), region = 56 }
  0x2c   : > { %1672 = dma.done.wait (%p2062_p8), [#allocation4], 4096  }
  0x2d   : > { %1674 = vsyncadd (%p2062_p8), [#allocation4], 4294963200  ;;  %s1403_s29 = sshll.u32 %s1396_s12, 4  ;;  %v1682_v1 = vmov 0   ;;  %v1564_v2 = vld [vmem:[%s2046_s1 + $0x4] ss:$8 sps:$4 sm:$0xff]   ;;  %v374_v58 = vlaneseq }
  0x2e   : > { %491 = vmatprep.mubr.bf16.mxu0 %v1682_v1  ;;  %p342_p2 = scmp.lt.s32.totalorder %s1403_s29, 31  ;;  %v1566_v3 = vld [vmem:[%s2046_s1] ss:$8 sps:$4 sm:$0xff]   ;;  %459 = vmatprep.subr.bf16.mxu0 %v1564_v2  ;;  %vm434_vm0 = vcmask 130048   ;;  %v1580_v9 = vld [vmem:[#allocation3 + $0x10] ss:$8 sps:$4 sm:$0xff]  }
  0x2f   : > { %460 = vmatpush1.bf16.msra.mxu0 %v1566_v3  ;;  %v1575_v6 = vld [vmem:[#allocation3 + $0x4] ss:$8 sps:$4 sm:$0xff]   ;;  %v1577_v7 = vld [vmem:[#allocation3] ss:$8 sps:$4 sm:$0xff]   ;;  %v1578_v8 = vld [vmem:[#allocation3 + $0x14] ss:$8 sps:$4 sm:$0xff]  }
  0x30   : > { %s2064_s29 = smov (!%p342_p2, %s1403_s29), 31  ;;  %824 = vmatprep.subr.bf16.mxu1 %v1575_v6  ;;  %v1581_v10 = vld [vmem:[#allocation3 + $0x24] ss:$8 sps:$4 sm:$0xff]   ;;  %v1583_v11 = vld [vmem:[#allocation3 + $0x20] ss:$8 sps:$4 sm:$0xff]   ;;  %v1629_v50 = vld [vmem:[%s2050_s5 + $0x58] sm:$0xff]  }
  0x31   : > { %s1404_s30 = sshll.u32 %s2064_s29, 2  ;;  %825 = vmatpush1.bf16.msra.mxu1 %v1577_v7  ;;  %v1584_v13 = vld [vmem:[#allocation3 + $0x34] ss:$8 sps:$4 sm:$0xff]   ;;  %v1586_v14 = vld [vmem:[#allocation3 + $0x30] ss:$8 sps:$4 sm:$0xff]   ;;  %v1625_v46 = vld [vmem:[%s2050_s5 + $0x48] sm:$0xff]  }
  0x32   : > { %s1793_s14 = scalar_lea.vmem %s2045_s0, %s1404_s30  ;;  %826 = vmatprep.subr.bf16.mxu1 %v1578_v8  ;;  %v1587_v15 = vld [vmem:[#allocation3 + $0x44] ss:$8 sps:$4 sm:$0xff]   ;;  %v1589_v16 = vld [vmem:[#allocation3 + $0x40] ss:$8 sps:$4 sm:$0xff]   ;;  %v1590_v18 = vld [vmem:[#allocation3 + $0x54] ss:$8 sps:$4 sm:$0xff]  }
  0x33   : > { %v1567_v4 = vld [vmem:[%s1793_s14] sm:$0xff]   ;;  %v1568_v5 = vld [vmem:[%s1793_s14 + $0x8] sm:$0xff]   ;;  %v1569_v12 = vld [vmem:[%s1793_s14 + $0x10] sm:$0xff]   ;;  %v1866_v59 = vshrl.u32 %v374_v58, 7  ;;  %s1406_s17 = sshll.u32 %s2064_s29, 3  ;;  %vm1311_vm1 = vcmask 7168  }
  0x34   : > { %1417 = vmatmul.mubr.msk.bf16.vlgmr.msra.gmra.mrb[0].mxu0 %vm434_vm0, %v1567_v4  ;;  %v1570_v17 = vld [vmem:[%s1793_s14 + $0x18] sm:$0xff]   ;;  %v1593_v20 = vld [vmem:[#allocation3 + $0x64] ss:$8 sps:$4 sm:$0xff]   ;;  %v1595_v21 = vld [vmem:[#allocation3 + $0x60] ss:$8 sps:$4 sm:$0xff]   ;;  %s2008_s20 = scalar_lea.vmem %s2054_s9, %s1406_s17 }
  0x35   : > { %501 = vmatprep.mubr.bf16.mxu0 %v1682_v1  ;;  %827 = vmatpush1.bf16.msra.mxu1 %v1580_v9  ;;  %v1592_v19 = vld [vmem:[#allocation3 + $0x50] ss:$8 sps:$4 sm:$0xff]   ;;  %v1571_v22 = vld [vmem:[%s1793_s14 + $0x20] sm:$0xff]   ;;  %v1572_v27 = vld [vmem:[%s1793_s14 + $0x28] sm:$0xff]   ;;  %v376_v60 = vsub.s32 0, %v1866_v59  ;;  %v380_v62 = vsub.s32 1, %v1866_v59 }
  0x36   : > { %828 = vmatprep.subr.bf16.mxu1 %v1581_v10  ;;  %v1596_v23 = vld [vmem:[#allocation3 + $0x74] ss:$8 sps:$4 sm:$0xff]   ;;  %v1598_v24 = vld [vmem:[#allocation3 + $0x70] ss:$8 sps:$4 sm:$0xff]   ;;  %v1599_v25 = vld [vmem:[#allocation3 + $0x84] ss:$8 sps:$4 sm:$0xff]  }
  0x37   : > { %v1601_v26 = vld [vmem:[#allocation3 + $0x80] ss:$8 sps:$4 sm:$0xff]   ;;  %v1602_v28 = vld [vmem:[#allocation3 + $0x94] ss:$8 sps:$4 sm:$0xff]   ;;  %v1604_v29 = vld [vmem:[#allocation3 + $0x90] ss:$8 sps:$4 sm:$0xff]  }
  0x38   : > { %v1605_v30 = vld [vmem:[#allocation3 + $0xa4] ss:$8 sps:$4 sm:$0xff]   ;;  %v1607_v31 = vld [vmem:[#allocation3 + $0xa0] ss:$8 sps:$4 sm:$0xff]   ;;  %v1608_v33 = vld [vmem:[#allocation3 + $0xb4] ss:$8 sps:$4 sm:$0xff]  }
  0x39   : > { %829 = vmatpush1.bf16.msra.mxu1 %v1583_v11  ;;  %v1573_v32 = vld [vmem:[%s1793_s14 + $0x30] sm:$0xff]   ;;  %v1613_v36 = vld [vmem:[#allocation3 + $0xc0] ss:$8 sps:$4 sm:$0xff]   ;;  %v1574_v37 = vld [vmem:[%s1793_s14 + $0x38] sm:$0xff]  }
  0x3a   : > { %830 = vmatprep.subr.bf16.mxu1 %v1584_v13  ;;  %v1610_v34 = vld [vmem:[#allocation3 + $0xb0] ss:$8 sps:$4 sm:$0xff]   ;;  %v1611_v35 = vld [vmem:[#allocation3 + $0xc4] ss:$8 sps:$4 sm:$0xff]   ;;  %v1614_v38 = vld [vmem:[#allocation3 + $0xd4] ss:$8 sps:$4 sm:$0xff]  }
  0x3b   : > { %v1616_v39 = vld [vmem:[#allocation3 + $0xd0] ss:$8 sps:$4 sm:$0xff]   ;;  %v1617_v40 = vld [vmem:[#allocation3 + $0xe4] ss:$8 sps:$4 sm:$0xff]   ;;  %v1619_v41 = vld [vmem:[#allocation3 + $0xe0] ss:$8 sps:$4 sm:$0xff]  }
  0x3c   : > { %1418 = vmatmul.mubr.msk.bf16.gmra.mrb[4].mxu0 %vm434_vm0, %v1568_v5  ;;  %v1620_v42 = vld [vmem:[#allocation3 + $0xf4] ss:$8 sps:$4 sm:$0xff]   ;;  %v1622_v43 = vld [vmem:[#allocation3 + $0xf0] ss:$8 sps:$4 sm:$0xff]   ;;  %v1626_v47 = vld [vmem:[%s2050_s5 + $0x8] sm:$0xff]  }
  0x3d   : > { %511 = vmatprep.mubr.bf16.mxu0 %v1682_v1  ;;  %831 = vmatpush1.bf16.msra.mxu1 %v1586_v14  ;;  %v1623_v44 = vld [vmem:[%s2050_s5 + $0x40] sm:$0xff]   ;;  %v1627_v48 = vld [vmem:[%s2050_s5 + $0x50] sm:$0xff]   ;;  %v1630_v51 = vld [vmem:[%s2050_s5 + $0x18] sm:$0xff]  }
  0x3e   : > { %832 = vmatprep.subr.bf16.mxu1 %v1587_v15  ;;  %v1624_v45 = vld [vmem:[%s2050_s5] sm:$0xff]   ;;  %1478 = vmatprep.subr.bf16.mxu0 %v1623_v44  ;;  %v1628_v49 = vld [vmem:[%s2050_s5 + $0x10] sm:$0xff]   ;;  %v1633_v54 = vld [vmem:[%s2050_s5 + $0x68] sm:$0xff]  }
  0x3f   : > { %1479 = vmatpush3.bf16.msra.mxu0 %v1624_v45  ;;  %v1631_v52 = vld [vmem:[%s2050_s5 + $0x60] sm:$0xff]   ;;  %v1634_v55 = vld [vmem:[%s2050_s5 + $0x28] sm:$0xff]   ;;  %v1635_v56 = vld [vmem:[%s2050_s5 + $0x70] sm:$0xff]  }
  0x40   : > { %1480 = vmatprep.subr.bf16.mxu0 %v1625_v46  ;;  %v1632_v53 = vld [vmem:[%s2050_s5 + $0x20] sm:$0xff]   ;;  %v1636_v57 = vld [vmem:[%s2050_s5 + $0x30] sm:$0xff]  }
  0x41   : > { %833 = vmatpush1.bf16.msra.mxu1 %v1589_v16  ;;  %v372_v61 = vld [vmem:[%s2047_s2] sm:$0x3] }
  0x42   : > { %834 = vmatprep.subr.bf16.mxu1 %v1590_v18  ;;  %v1875_v63 = vrot.slane %v372_v61, %v376_v60  ;;  %v1879_v0 = vrot.slane %v372_v61, %v380_v62 }
  0x43   : > { %1481 = vmatpush3.bf16.msra.mxu0 %v1626_v47 }
  0x44   : > { %1419 = vmatmul.mubr.msk.bf16.gmra.mrb[8].mxu0 %vm434_vm0, %v1569_v12  ;;  %1482 = vmatprep.subr.bf16.mxu0 %v1627_v48 }
  0x45   : > { %521 = vmatprep.mubr.bf16.mxu0 %v1682_v1  ;;  %835 = vmatpush1.bf16.msra.mxu1 %v1592_v19 }
  0x46   : > { %836 = vmatprep.subr.bf16.mxu1 %v1593_v20 }
  0x47   : > { %1483 = vmatpush3.bf16.msra.mxu0 %v1628_v49 }
  0x48   : > { %1484 = vmatprep.subr.bf16.mxu0 %v1629_v50 }
  0x49   : > { %837 = vmatpush1.bf16.msra.mxu1 %v1595_v21 }
  0x4a   : > { %838 = vmatprep.subr.bf16.mxu1 %v1596_v23 }
  0x4b   : > { %1485 = vmatpush3.bf16.msra.mxu0 %v1630_v51 }
  0x4c   : > { %1420 = vmatmul.mubr.msk.bf16.gmra.mrb[12].mxu0 %vm434_vm0, %v1570_v17  ;;  %1486 = vmatprep.subr.bf16.mxu0 %v1631_v52 }
  0x4d   : > { %531 = vmatprep.mubr.bf16.mxu0 %v1682_v1  ;;  %839 = vmatpush1.bf16.msra.mxu1 %v1598_v24 }
  0x4e   : > { %840 = vmatprep.subr.bf16.mxu1 %v1599_v25 }
  0x4f   : > { %1487 = vmatpush3.bf16.msra.mxu0 %v1632_v53 }
  0x50   : > { %1488 = vmatprep.subr.bf16.mxu0 %v1633_v54 }
  0x51   : > { %841 = vmatpush1.bf16.msra.mxu1 %v1601_v26 }
  0x52   : > { %842 = vmatprep.subr.bf16.mxu1 %v1602_v28 }
  0x53   : > { %1489 = vmatpush3.bf16.msra.mxu0 %v1634_v55 }
  0x54   : > { %1421 = vmatmul.mubr.msk.bf16.gmra.mrb[16].mxu0 %vm434_vm0, %v1571_v22  ;;  %1490 = vmatprep.subr.bf16.mxu0 %v1635_v56 }
  0x55   : > { %541 = vmatprep.mubr.bf16.mxu0 %v1682_v1  ;;  %843 = vmatpush1.bf16.msra.mxu1 %v1604_v29 }
  0x56   : > { %844 = vmatprep.subr.bf16.mxu1 %v1605_v30 }
  0x57   : > { %1491 = vmatpush3.bf16.msra.mxu0 %v1636_v57 }
  0x59   : > { %845 = vmatpush1.bf16.msra.mxu1 %v1607_v31 }
  0x5a   : > { %846 = vmatprep.subr.bf16.mxu1 %v1608_v33 }
  0x5c   : > { %1422 = vmatmul.mubr.msk.bf16.gmra.mrb[20].mxu0 %vm434_vm0, %v1572_v27 }
  0x5d   : > { %551 = vmatprep.mubr.bf16.mxu0 %v1682_v1  ;;  %847 = vmatpush1.bf16.msra.mxu1 %v1610_v34 }
  0x5e   : > { %848 = vmatprep.subr.bf16.mxu1 %v1611_v35 }
  0x61   : > { %849 = vmatpush1.bf16.msra.mxu1 %v1613_v36 }
  0x62   : > { %850 = vmatprep.subr.bf16.mxu1 %v1614_v38 }
  0x64   : > { %1423 = vmatmul.mubr.msk.bf16.gmra.mrb[24].mxu0 %vm434_vm0, %v1573_v32 }
  0x65   : > { %561 = vmatprep.mubr.bf16.mxu0 %v1682_v1  ;;  %851 = vmatpush1.bf16.msra.mxu1 %v1616_v39 }
  0x66   : > { %852 = vmatprep.subr.bf16.mxu1 %v1617_v40 }
  0x69   : > { %853 = vmatpush1.bf16.msra.mxu1 %v1619_v41 }
  0x6a   : > { %854 = vmatprep.subr.bf16.mxu1 %v1620_v42 }
  0x6c   : > { %1424 = vmatmul.mubr.msk.bf16.gmra.mrb[28].mxu0 %vm434_vm0, %v1574_v37 }
  0x6d   : > { %855 = vmatpush1.bf16.msra.mxu1 %v1622_v43 }
 0x107   : > { %v493_v1 = vpop.f32.mrb[0].mxu0 }
 0x108   : > { %v494_v2 = vadd.f32 %v493_v1, %v1875_v63  ;;  %v495_v3 = vpop.f32.mrb[1].mxu0 }
 0x109   : > { %v496_v4 = vadd.f32 %v495_v3, %v1879_v0  ;;  %v497_v5 = vpop.f32.mrb[2].mxu0 }
 0x10a   : > { %v498_v6 = vadd.f32 %v497_v5, %v1875_v63  ;;  %v499_v7 = vpop.f32.mrb[3].mxu0  ;;  %v572_v9 = vmax.f32 %v494_v2, 0.0 }
 0x10b   : > { %v500_v8 = vadd.f32 %v499_v7, %v1879_v0  ;;  %v573_v11 = vmax.f32 %v496_v4, 0.0 }
 0x10c   : > { %v574_v10 = vmax.f32 %v498_v6, 0.0 }
 0x10d   : > { %v575_v12 = vmax.f32 %v500_v8, 0.0 }
 0x10e   : > { %v604_v13 = vpack.c.bf16 %v574_v10, %v572_v9 }
 0x10f   : > { %v503_v14 = vpop.f32.mrb[4].mxu0  ;;  %v605_v15 = vpack.c.bf16 %v575_v12, %v573_v11 }
 0x110   : > { %v504_v16 = vadd.f32 %v503_v14, %v1875_v63  ;;  %v505_v17 = vpop.f32.mrb[5].mxu0 }
 0x111   : > { %v506_v18 = vadd.f32 %v505_v17, %v1879_v0  ;;  %v507_v19 = vpop.f32.mrb[6].mxu0  ;;  %856 = vmatprep.mubr.bf16.mxu1 %v605_v15 }
 0x112   : > { %v508_v20 = vadd.f32 %v507_v19, %v1875_v63  ;;  %v509_v21 = vpop.f32.mrb[7].mxu0  ;;  %857 = vmatmul.mubr.bf16.vlgmr.msra.gmra.mrb[0].mxu1 %v604_v13  ;;  %v576_v23 = vmax.f32 %v504_v16, 0.0 }
 0x113   : > { %v510_v22 = vadd.f32 %v509_v21, %v1879_v0  ;;  %v577_v25 = vmax.f32 %v506_v18, 0.0 }
 0x114   : > { %v578_v24 = vmax.f32 %v508_v20, 0.0 }
 0x115   : > { %v579_v26 = vmax.f32 %v510_v22, 0.0 }
 0x116   : > { %v606_v27 = vpack.c.bf16 %v578_v24, %v576_v23 }
 0x117   : > { %v607_v28 = vpack.c.bf16 %v579_v26, %v577_v25  ;;  %v513_v29 = vpop.f32.mrb[8].mxu0 }
 0x118   : > { %v514_v30 = vadd.f32 %v513_v29, %v1875_v63  ;;  %v515_v31 = vpop.f32.mrb[9].mxu0 }
 0x119   : > { %v516_v32 = vadd.f32 %v515_v31, %v1879_v0  ;;  %v517_v33 = vpop.f32.mrb[10].mxu0  ;;  %866 = vmatprep.mubr.bf16.mxu1 %v607_v28 }
 0x11a   : > { %v518_v34 = vadd.f32 %v517_v33, %v1875_v63  ;;  %v519_v35 = vpop.f32.mrb[11].mxu0  ;;  %867 = vmatmul.mubr.bf16.gmra.mrb[4].mxu1 %v606_v27  ;;  %v580_v37 = vmax.f32 %v514_v30, 0.0 }
 0x11b   : > { %v520_v36 = vadd.f32 %v519_v35, %v1879_v0  ;;  %v581_v39 = vmax.f32 %v516_v32, 0.0 }
 0x11c   : > { %v582_v38 = vmax.f32 %v518_v34, 0.0 }
 0x11d   : > { %v583_v40 = vmax.f32 %v520_v36, 0.0 }
 0x11e   : > { %v608_v41 = vpack.c.bf16 %v582_v38, %v580_v37 }
 0x11f   : > { %v609_v42 = vpack.c.bf16 %v583_v40, %v581_v39  ;;  %v523_v43 = vpop.f32.mrb[12].mxu0 }
 0x120   : > { %v524_v44 = vadd.f32 %v523_v43, %v1875_v63  ;;  %v525_v45 = vpop.f32.mrb[13].mxu0 }
 0x121   : > { %v526_v46 = vadd.f32 %v525_v45, %v1879_v0  ;;  %v527_v47 = vpop.f32.mrb[14].mxu0  ;;  %876 = vmatprep.mubr.bf16.mxu1 %v609_v42 }
 0x122   : > { %v528_v48 = vadd.f32 %v527_v47, %v1875_v63  ;;  %v529_v49 = vpop.f32.mrb[15].mxu0  ;;  %877 = vmatmul.mubr.bf16.gmra.mrb[8].mxu1 %v608_v41  ;;  %v584_v51 = vmax.f32 %v524_v44, 0.0 }
 0x123   : > { %v530_v50 = vadd.f32 %v529_v49, %v1879_v0  ;;  %v585_v53 = vmax.f32 %v526_v46, 0.0 }
 0x124   : > { %v586_v52 = vmax.f32 %v528_v48, 0.0 }
 0x125   : > { %v587_v54 = vmax.f32 %v530_v50, 0.0 }
 0x126   : > { %v610_v55 = vpack.c.bf16 %v586_v52, %v584_v51 }
 0x127   : > { %v611_v56 = vpack.c.bf16 %v587_v54, %v585_v53  ;;  %v533_v57 = vpop.f32.mrb[16].mxu0  ;;  %v1637_v54 = vld [vmem:[%s2050_s5 + $0x78] sm:$0xff]  }
 0x128   : > { %v534_v58 = vadd.f32 %v533_v57, %v1875_v63  ;;  %v535_v61 = vpop.f32.mrb[17].mxu0  ;;  %1492 = vmatprep.subr.bf16.mxu0 %v1637_v54 }
 0x129   : > { %v536_v1 = vadd.f32 %v535_v61, %v1879_v0  ;;  %v537_v2 = vpop.f32.mrb[18].mxu0  ;;  %886 = vmatprep.mubr.bf16.mxu1 %v611_v56 }
 0x12a   : > { %v538_v3 = vadd.f32 %v537_v2, %v1875_v63  ;;  %v539_v4 = vpop.f32.mrb[19].mxu0  ;;  %887 = vmatmul.mubr.bf16.gmra.mrb[12].mxu1 %v610_v55  ;;  %v588_v6 = vmax.f32 %v534_v58, 0.0 }
 0x12b   : > { %v540_v5 = vadd.f32 %v539_v4, %v1879_v0  ;;  %v589_v8 = vmax.f32 %v536_v1, 0.0 }
 0x12c   : > { %v590_v7 = vmax.f32 %v538_v3, 0.0 }
 0x12d   : > { %v591_v9 = vmax.f32 %v540_v5, 0.0 }
 0x12e   : > { %v612_v10 = vpack.c.bf16 %v590_v7, %v588_v6 }
 0x12f   : > { %v613_v11 = vpack.c.bf16 %v591_v9, %v589_v8  ;;  %v543_v12 = vpop.f32.mrb[20].mxu0 }
 0x130   : > { %v544_v13 = vadd.f32 %v543_v12, %v1875_v63  ;;  %v545_v14 = vpop.f32.mrb[21].mxu0 }
 0x131   : > { %v546_v15 = vadd.f32 %v545_v14, %v1879_v0  ;;  %v547_v16 = vpop.f32.mrb[22].mxu0  ;;  %896 = vmatprep.mubr.bf16.mxu1 %v613_v11 }
 0x132   : > { %v548_v17 = vadd.f32 %v547_v16, %v1875_v63  ;;  %v549_v18 = vpop.f32.mrb[23].mxu0  ;;  %897 = vmatmul.mubr.bf16.gmra.mrb[16].mxu1 %v612_v10  ;;  %v592_v20 = vmax.f32 %v544_v13, 0.0 }
 0x133   : > { %v550_v19 = vadd.f32 %v549_v18, %v1879_v0  ;;  %v593_v22 = vmax.f32 %v546_v15, 0.0 }
 0x134   : > { %v594_v21 = vmax.f32 %v548_v17, 0.0 }
 0x135   : > { %v595_v23 = vmax.f32 %v550_v19, 0.0 }
 0x136   : > { %v614_v24 = vpack.c.bf16 %v594_v21, %v592_v20 }
 0x137   : > { %v615_v25 = vpack.c.bf16 %v595_v23, %v593_v22  ;;  %v553_v26 = vpop.f32.mrb[24].mxu0 }
 0x138   : > { %v554_v27 = vadd.f32 %v553_v26, %v1875_v63  ;;  %v555_v28 = vpop.f32.mrb[25].mxu0 }
 0x139   : > { %v556_v29 = vadd.f32 %v555_v28, %v1879_v0  ;;  %v557_v30 = vpop.f32.mrb[26].mxu0  ;;  %906 = vmatprep.mubr.bf16.mxu1 %v615_v25 }
 0x13a   : > { %v558_v31 = vadd.f32 %v557_v30, %v1875_v63  ;;  %v559_v32 = vpop.f32.mrb[27].mxu0  ;;  %907 = vmatmul.mubr.bf16.gmra.mrb[20].mxu1 %v614_v24  ;;  %v596_v34 = vmax.f32 %v554_v27, 0.0 }
 0x13b   : > { %v560_v33 = vadd.f32 %v559_v32, %v1879_v0  ;;  %v597_v36 = vmax.f32 %v556_v29, 0.0 }
 0x13c   : > { %v598_v35 = vmax.f32 %v558_v31, 0.0 }
 0x13d   : > { %v599_v37 = vmax.f32 %v560_v33, 0.0 }
 0x13e   : > { %v616_v38 = vpack.c.bf16 %v598_v35, %v596_v34 }
 0x13f   : > { %v617_v39 = vpack.c.bf16 %v599_v37, %v597_v36  ;;  %v563_v40 = vpop.f32.mrb[28].mxu0 }
 0x140   : > { %v564_v41 = vadd.f32 %v563_v40, %v1875_v63  ;;  %v565_v42 = vpop.f32.mrb[29].mxu0 }
 0x141   : > { %v566_v43 = vadd.f32 %v565_v42, %v1879_v0  ;;  %v567_v44 = vpop.f32.mrb[30].mxu0  ;;  %916 = vmatprep.mubr.bf16.mxu1 %v617_v39 }
 0x142   : > { %v568_v45 = vadd.f32 %v567_v44, %v1875_v63  ;;  %v569_v46 = vpop.f32.mrb[31].mxu0  ;;  %917 = vmatmul.mubr.bf16.gmra.mrb[24].mxu1 %v616_v38  ;;  %v600_v48 = vmax.f32 %v564_v41, 0.0  ;;  %v1638_v63 = vld [vmem:[%s2050_s5 + $0x38] sm:$0xff]  }
 0x143   : > { %v570_v47 = vadd.f32 %v569_v46, %v1879_v0  ;;  %v601_v50 = vmax.f32 %v566_v43, 0.0  ;;  %1493 = vmatpush3.bf16.msra.mxu0 %v1638_v63  ;;  %v652_v0 = vld [vmem:[%s2049_s4] sm:$0x3] }
 0x144   : > { %v602_v49 = vmax.f32 %v568_v45, 0.0  ;;  %v1924_v55 = vrot.slane %v652_v0, %v376_v60  ;;  %v1928_v56 = vrot.slane %v652_v0, %v380_v62 }
 0x145   : > { %v603_v51 = vmax.f32 %v570_v47, 0.0 }
 0x146   : > { %v618_v52 = vpack.c.bf16 %v602_v49, %v600_v48 }
 0x147   : > { %v619_v53 = vpack.c.bf16 %v603_v51, %v601_v50 }
 0x149   : > { %926 = vmatprep.mubr.bf16.mxu1 %v619_v53 }
 0x14a   : > { %927 = vmatmul.mubr.bf16.gmra.mrb[28].mxu1 %v618_v52 }
 0x1e5   : > { %v858_v57 = vpop.f32.mrb[0].mxu1 }
 0x1e6   : > { %v859_v58 = vadd.f32 %v858_v57, %v1924_v55  ;;  %v860_v61 = vpop.f32.mrb[1].mxu1 }
 0x1e7   : > { %v861_v1 = vadd.f32 %v860_v61, %v1928_v56  ;;  %v862_v2 = vpop.f32.mrb[2].mxu1 }
 0x1e8   : > { %v863_v3 = vadd.f32 %v862_v2, %v1924_v55  ;;  %v864_v4 = vpop.f32.mrb[3].mxu1  ;;  %v937_v6 = vmax.f32 %v859_v58, 0.0 }
 0x1e9   : > { %v865_v5 = vadd.f32 %v864_v4, %v1928_v56  ;;  %v938_v60 = vmax.f32 %v861_v1, 0.0 }
 0x1ea   : > { %v939_v7 = vmax.f32 %v863_v3, 0.0 }
 0x1eb   : > { %v940_v8 = vmax.f32 %v865_v5, 0.0 }
 0x1ec   : > { %v969_v9 = vpack.c.bf16 %v939_v7, %v937_v6 }
 0x1ed   : > { %v970_v59 = vpack.c.bf16 %v940_v8, %v938_v60  ;;  %v868_v62 = vpop.f32.mrb[4].mxu1 }
 0x1ee   : > { %v869_v10 = vadd.f32 %v868_v62, %v1924_v55  ;;  %v870_v11 = vpop.f32.mrb[5].mxu1 }
 0x1ef   : > { %v871_v12 = vadd.f32 %v870_v11, %v1928_v56  ;;  %v872_v13 = vpop.f32.mrb[6].mxu1  ;;  %1152 = vmatprep.mubr.bf16.mxu0 %v970_v59 }
 0x1f0   : > { %v873_v14 = vadd.f32 %v872_v13, %v1924_v55  ;;  %v874_v15 = vpop.f32.mrb[7].mxu1  ;;  %1153 = vmatmul.mubr.bf16.vlgmr.msra.gmra.mrb[32].mxu0 %v969_v9  ;;  %v941_v17 = vmax.f32 %v869_v10, 0.0 }
 0x1f1   : > { %v875_v16 = vadd.f32 %v874_v15, %v1928_v56  ;;  %v942_v19 = vmax.f32 %v871_v12, 0.0 }
 0x1f2   : > { %v943_v18 = vmax.f32 %v873_v14, 0.0 }
 0x1f3   : > { %v944_v20 = vmax.f32 %v875_v16, 0.0 }
 0x1f4   : > { %v971_v21 = vpack.c.bf16 %v943_v18, %v941_v17 }
 0x1f5   : > { %v972_v22 = vpack.c.bf16 %v944_v20, %v942_v19  ;;  %v878_v23 = vpop.f32.mrb[8].mxu1 }
 0x1f6   : > { %v879_v24 = vadd.f32 %v878_v23, %v1924_v55  ;;  %v880_v25 = vpop.f32.mrb[9].mxu1 }
 0x1f7   : > { %v881_v26 = vadd.f32 %v880_v25, %v1928_v56  ;;  %v882_v27 = vpop.f32.mrb[10].mxu1  ;;  %1160 = vmatprep.mubr.bf16.mxu0 %v972_v22 }
 0x1f8   : > { %v883_v28 = vadd.f32 %v882_v27, %v1924_v55  ;;  %v884_v29 = vpop.f32.mrb[11].mxu1  ;;  %1161 = vmatmul.mubr.bf16.gmra.mrb[36].mxu0 %v971_v21  ;;  %v945_v31 = vmax.f32 %v879_v24, 0.0 }
 0x1f9   : > { %v885_v30 = vadd.f32 %v884_v29, %v1928_v56  ;;  %v946_v33 = vmax.f32 %v881_v26, 0.0 }
 0x1fa   : > { %v947_v32 = vmax.f32 %v883_v28, 0.0 }
 0x1fb   : > { %v948_v34 = vmax.f32 %v885_v30, 0.0 }
 0x1fc   : > { %v973_v35 = vpack.c.bf16 %v947_v32, %v945_v31 }
 0x1fd   : > { %v974_v36 = vpack.c.bf16 %v948_v34, %v946_v33  ;;  %v888_v37 = vpop.f32.mrb[12].mxu1 }
 0x1fe   : > { %v889_v38 = vadd.f32 %v888_v37, %v1924_v55  ;;  %v890_v39 = vpop.f32.mrb[13].mxu1 }
 0x1ff   : > { %v891_v40 = vadd.f32 %v890_v39, %v1928_v56  ;;  %v892_v41 = vpop.f32.mrb[14].mxu1  ;;  %1168 = vmatprep.mubr.bf16.mxu0 %v974_v36 }
 0x200   : > { %v893_v42 = vadd.f32 %v892_v41, %v1924_v55  ;;  %v894_v43 = vpop.f32.mrb[15].mxu1  ;;  %1169 = vmatmul.mubr.bf16.gmra.mrb[40].mxu0 %v973_v35  ;;  %v949_v45 = vmax.f32 %v889_v38, 0.0 }
 0x201   : > { %v895_v44 = vadd.f32 %v894_v43, %v1928_v56  ;;  %v950_v47 = vmax.f32 %v891_v40, 0.0 }
 0x202   : > { %v951_v46 = vmax.f32 %v893_v42, 0.0 }
 0x203   : > { %v952_v48 = vmax.f32 %v895_v44, 0.0 }
 0x204   : > { %v975_v49 = vpack.c.bf16 %v951_v46, %v949_v45 }
 0x205   : > { %v976_v50 = vpack.c.bf16 %v952_v48, %v950_v47  ;;  %v898_v51 = vpop.f32.mrb[16].mxu1  ;;  %v1965_v47 = vld [vmem:[%s2051_s6] ss:$0 sm:$0xff] }
 0x206   : > { %v899_v52 = vadd.f32 %v898_v51, %v1924_v55  ;;  %v900_v53 = vpop.f32.mrb[17].mxu1  ;;  %v1971_v51 = vld [vmem:[%s2052_s7] ss:$0 sm:$0xff] }
 0x207   : > { %v901_v54 = vadd.f32 %v900_v53, %v1928_v56  ;;  %v902_v63 = vpop.f32.mrb[18].mxu1  ;;  %1176 = vmatprep.mubr.bf16.mxu0 %v976_v50 }
 0x208   : > { %v903_v0 = vadd.f32 %v902_v63, %v1924_v55  ;;  %v904_v57 = vpop.f32.mrb[19].mxu1  ;;  %1177 = vmatmul.mubr.bf16.gmra.mrb[44].mxu0 %v975_v49  ;;  %v953_v61 = vmax.f32 %v899_v52, 0.0 }
 0x209   : > { %v905_v58 = vadd.f32 %v904_v57, %v1928_v56  ;;  %v954_v2 = vmax.f32 %v901_v54, 0.0 }
 0x20a   : > { %v955_v1 = vmax.f32 %v903_v0, 0.0 }
 0x20b   : > { %v956_v3 = vmax.f32 %v905_v58, 0.0 }
 0x20c   : > { %v977_v4 = vpack.c.bf16 %v955_v1, %v953_v61 }
 0x20d   : > { %v978_v5 = vpack.c.bf16 %v956_v3, %v954_v2  ;;  %v908_v6 = vpop.f32.mrb[20].mxu1 }
 0x20e   : > { %v909_v7 = vadd.f32 %v908_v6, %v1924_v55  ;;  %v910_v60 = vpop.f32.mrb[21].mxu1 }
 0x20f   : > { %v911_v8 = vadd.f32 %v910_v60, %v1928_v56  ;;  %v912_v9 = vpop.f32.mrb[22].mxu1  ;;  %1184 = vmatprep.mubr.bf16.mxu0 %v978_v5 }
 0x210   : > { %v913_v59 = vadd.f32 %v912_v9, %v1924_v55  ;;  %v914_v62 = vpop.f32.mrb[23].mxu1  ;;  %1185 = vmatmul.mubr.bf16.gmra.mrb[48].mxu0 %v977_v4  ;;  %v957_v11 = vmax.f32 %v909_v7, 0.0 }
 0x211   : > { %v915_v10 = vadd.f32 %v914_v62, %v1928_v56  ;;  %v958_v13 = vmax.f32 %v911_v8, 0.0 }
 0x212   : > { %v959_v12 = vmax.f32 %v913_v59, 0.0 }
 0x213   : > { %v960_v14 = vmax.f32 %v915_v10, 0.0 }
 0x214   : > { %v979_v15 = vpack.c.bf16 %v959_v12, %v957_v11 }
 0x215   : > { %v980_v16 = vpack.c.bf16 %v960_v14, %v958_v13  ;;  %v918_v17 = vpop.f32.mrb[24].mxu1 }
 0x216   : > { %v919_v18 = vadd.f32 %v918_v17, %v1924_v55  ;;  %v920_v19 = vpop.f32.mrb[25].mxu1 }
 0x217   : > { %v921_v20 = vadd.f32 %v920_v19, %v1928_v56  ;;  %v922_v21 = vpop.f32.mrb[26].mxu1  ;;  %1192 = vmatprep.mubr.bf16.mxu0 %v980_v16 }
 0x218   : > { %v923_v22 = vadd.f32 %v922_v21, %v1924_v55  ;;  %v924_v23 = vpop.f32.mrb[27].mxu1  ;;  %1193 = vmatmul.mubr.bf16.gmra.mrb[52].mxu0 %v979_v15  ;;  %v961_v25 = vmax.f32 %v919_v18, 0.0 }
 0x219   : > { %v925_v24 = vadd.f32 %v924_v23, %v1928_v56  ;;  %v962_v27 = vmax.f32 %v921_v20, 0.0 }
 0x21a   : > { %v963_v26 = vmax.f32 %v923_v22, 0.0 }
 0x21b   : > { %v964_v28 = vmax.f32 %v925_v24, 0.0 }
 0x21c   : > { %v981_v29 = vpack.c.bf16 %v963_v26, %v961_v25 }
 0x21d   : > { %v982_v30 = vpack.c.bf16 %v964_v28, %v962_v27  ;;  %v928_v31 = vpop.f32.mrb[28].mxu1 }
 0x21e   : > { %v929_v32 = vadd.f32 %v928_v31, %v1924_v55  ;;  %v930_v33 = vpop.f32.mrb[29].mxu1 }
 0x21f   : > { %v931_v34 = vadd.f32 %v930_v33, %v1928_v56  ;;  %v932_v35 = vpop.f32.mrb[30].mxu1  ;;  %1200 = vmatprep.mubr.bf16.mxu0 %v982_v30 }
 0x220   : > { %v933_v36 = vadd.f32 %v932_v35, %v1924_v55  ;;  %v934_v37 = vpop.f32.mrb[31].mxu1  ;;  %1201 = vmatmul.mubr.bf16.gmra.mrb[56].mxu0 %v981_v29  ;;  %v965_v39 = vmax.f32 %v929_v32, 0.0 }
 0x221   : > { %v935_v38 = vadd.f32 %v934_v37, %v1928_v56  ;;  %v966_v41 = vmax.f32 %v931_v34, 0.0 }
 0x222   : > { %v967_v40 = vmax.f32 %v933_v36, 0.0 }
 0x223   : > { %v968_v42 = vmax.f32 %v935_v38, 0.0 }
 0x224   : > { %v983_v43 = vpack.c.bf16 %v967_v40, %v965_v39 }
 0x225   : > { %v984_v44 = vpack.c.bf16 %v968_v42, %v966_v41 }
 0x227   : > { %1208 = vmatprep.mubr.bf16.mxu0 %v984_v44 }
 0x228   : > { %1209 = vmatmul.mubr.bf16.gmra.mrb[60].mxu0 %v983_v43 }
 0x2c3   : > { %v1494_v45 = vpop.f32.mrb[32].mxu0 }
 0x2c4   : > { %v1495_v46 = vpop.f32.mrb[33].mxu0 }
 0x2c5   : > { %v1496_v55 = vadd.f32 %v1495_v46, %v1494_v45  ;;  %v1497_v48 = vpop.f32.mrb[34].mxu0 }
 0x2c6   : > { %v1498_v49 = vpop.f32.mrb[35].mxu0 }
 0x2c7   : > { %v1499_v50 = vadd.f32 %v1498_v49, %v1497_v48  ;;  %v1155_v56 = vadd.f32 %v1496_v55, %v1965_v47 }
 0x2c9   : > { %v1158_v52 = vadd.f32 %v1499_v50, %v1965_v47  ;;  %v1217_v53 = vmax.f32 %v1155_v56, 0.0 }
 0x2cb   : > { %v1218_v54 = vmax.f32 %v1158_v52, 0.0  ;;  %v1500_v63 = vpop.f32.mrb[36].mxu0  ;;  %v1240_v0 = vmul.f32 %v1971_v51, %v1217_v53 }
 0x2cc   : > { %v1501_v57 = vpop.f32.mrb[37].mxu0 }
 0x2cd   : > { %v1502_v58 = vadd.f32 %v1501_v57, %v1500_v63  ;;  %v1503_v61 = vpop.f32.mrb[38].mxu0  ;;  %1256 = vadd.xlane.f32.xlu0 %v1240_v0  ;;  %v1241_v3 = vmul.f32 %v1971_v51, %v1218_v54 }
 0x2ce   : > { %v1504_v1 = vpop.f32.mrb[39].mxu0 }
 0x2cf   : > { %v1505_v2 = vadd.f32 %v1504_v1, %v1503_v61  ;;  %v1163_v4 = vadd.f32 %v1502_v58, %v1965_v47 }
 0x2d1   : > { %v1166_v5 = vadd.f32 %v1505_v2, %v1965_v47  ;;  %1258 = vadd.xlane.f32.xlu0 %v1241_v3  ;;  %v1219_v6 = vmax.f32 %v1163_v4, 0.0 }
 0x2d3   : > { %v1220_v7 = vmax.f32 %v1166_v5, 0.0  ;;  %v1506_v60 = vpop.f32.mrb[40].mxu0  ;;  %v1242_v8 = vmul.f32 %v1971_v51, %v1219_v6 }
 0x2d4   : > { %v1507_v9 = vpop.f32.mrb[41].mxu0 }
 0x2d5   : > { %v1508_v59 = vadd.f32 %v1507_v9, %v1506_v60  ;;  %v1509_v62 = vpop.f32.mrb[42].mxu0  ;;  %1260 = vadd.xlane.f32.xlu1 %v1242_v8  ;;  %v1243_v13 = vmul.f32 %v1971_v51, %v1220_v7 }
 0x2d6   : > { %v1510_v10 = vpop.f32.mrb[43].mxu0 }
 0x2d7   : > { %v1171_v11 = vadd.f32 %v1508_v59, %v1965_v47  ;;  %v1511_v12 = vadd.f32 %v1510_v10, %v1509_v62 }
 0x2d9   : > { %v1221_v14 = vmax.f32 %v1171_v11, 0.0  ;;  %v1174_v15 = vadd.f32 %v1511_v12, %v1965_v47  ;;  %1262 = vadd.xlane.f32.xlu1 %v1243_v13 }
 0x2db   : > { %v1222_v16 = vmax.f32 %v1174_v15, 0.0  ;;  %v1512_v17 = vpop.f32.mrb[44].mxu0  ;;  %v1244_v18 = vmul.f32 %v1971_v51, %v1221_v14 }
 0x2dc   : > { %v1513_v19 = vpop.f32.mrb[45].mxu0 }
 0x2dd   : > { %v1514_v20 = vadd.f32 %v1513_v19, %v1512_v17  ;;  %v1515_v21 = vpop.f32.mrb[46].mxu0  ;;  %1264 = vadd.xlane.f32.xlu0 %v1244_v18  ;;  %v1245_v22 = vmul.f32 %v1971_v51, %v1222_v16  ;;  %v1475_v17 = vld [vmem:[#allocation2] ss:$0 sm:$0xff] }
 0x2de   : > { %v1516_v23 = vpop.f32.mrb[47].mxu0 }
 0x2df   : > { %v1179_v24 = vadd.f32 %v1514_v20, %v1965_v47  ;;  %v1517_v25 = vadd.f32 %v1516_v23, %v1515_v21  ;;  %1266 = vadd.xlane.f32.xlu1 %v1245_v22 }
 0x2e1   : > { %v1223_v26 = vmax.f32 %v1179_v24, 0.0  ;;  %v1182_v27 = vadd.f32 %v1517_v25, %v1965_v47 }
 0x2e3   : > { %v1224_v28 = vmax.f32 %v1182_v27, 0.0  ;;  %v1518_v29 = vpop.f32.mrb[48].mxu0  ;;  %v1246_v30 = vmul.f32 %v1971_v51, %v1223_v26 }
 0x2e4   : > { %v1519_v31 = vpop.f32.mrb[49].mxu0 }
 0x2e5   : > { %v1520_v32 = vadd.f32 %v1519_v31, %v1518_v29  ;;  %v1521_v33 = vpop.f32.mrb[50].mxu0  ;;  %1268 = vadd.xlane.f32.xlu0 %v1246_v30  ;;  %v1247_v34 = vmul.f32 %v1971_v51, %v1224_v28 }
 0x2e6   : > { %v1522_v35 = vpop.f32.mrb[51].mxu0 }
 0x2e7   : > { %v1187_v36 = vadd.f32 %v1520_v32, %v1965_v47  ;;  %v1523_v37 = vadd.f32 %v1522_v35, %v1521_v33  ;;  %1270 = vadd.xlane.f32.xlu1 %v1247_v34 }
 0x2e9   : > { %v1225_v38 = vmax.f32 %v1187_v36, 0.0  ;;  %v1190_v39 = vadd.f32 %v1523_v37, %v1965_v47 }
 0x2eb   : > { %v1226_v40 = vmax.f32 %v1190_v39, 0.0  ;;  %v1524_v41 = vpop.f32.mrb[52].mxu0  ;;  %v1248_v42 = vmul.f32 %v1971_v51, %v1225_v38 }
 0x2ec   : > { %v1525_v43 = vpop.f32.mrb[53].mxu0 }
 0x2ed   : > { %v1526_v44 = vadd.f32 %v1525_v43, %v1524_v41  ;;  %v1527_v45 = vpop.f32.mrb[54].mxu0  ;;  %1272 = vadd.xlane.f32.xlu0 %v1248_v42  ;;  %v1249_v46 = vmul.f32 %v1971_v51, %v1226_v40 }
 0x2ee   : > { %v1528_v55 = vpop.f32.mrb[55].mxu0 }
 0x2ef   : > { %v1195_v48 = vadd.f32 %v1526_v44, %v1965_v47  ;;  %v1529_v49 = vadd.f32 %v1528_v55, %v1527_v45  ;;  %1274 = vadd.xlane.f32.xlu1 %v1249_v46 }
 0x2f1   : > { %v1227_v50 = vmax.f32 %v1195_v48, 0.0  ;;  %v1198_v56 = vadd.f32 %v1529_v49, %v1965_v47 }
 0x2f3   : > { %v1228_v52 = vmax.f32 %v1198_v56, 0.0  ;;  %v1530_v53 = vpop.f32.mrb[56].mxu0  ;;  %v1250_v54 = vmul.f32 %v1971_v51, %v1227_v50 }
 0x2f4   : > { %v1531_v63 = vpop.f32.mrb[57].mxu0 }
 0x2f5   : > { %v1532_v0 = vadd.f32 %v1531_v63, %v1530_v53  ;;  %v1533_v57 = vpop.f32.mrb[58].mxu0  ;;  %1276 = vadd.xlane.f32.xlu0 %v1250_v54  ;;  %v1251_v58 = vmul.f32 %v1971_v51, %v1228_v52 }
 0x2f6   : > { %v1534_v61 = vpop.f32.mrb[59].mxu0 }
 0x2f7   : > { %v1203_v1 = vadd.f32 %v1532_v0, %v1965_v47  ;;  %v1535_v2 = vadd.f32 %v1534_v61, %v1533_v57  ;;  %1278 = vadd.xlane.f32.xlu1 %v1251_v58 }
 0x2f9   : > { %v1229_v3 = vmax.f32 %v1203_v1, 0.0  ;;  %v1206_v4 = vadd.f32 %v1535_v2, %v1965_v47 }
 0x2fb   : > { %v1230_v5 = vmax.f32 %v1206_v4, 0.0  ;;  %v1536_v6 = vpop.f32.mrb[60].mxu0  ;;  %v1252_v7 = vmul.f32 %v1971_v51, %v1229_v3 }
 0x2fc   : > { %v1537_v60 = vpop.f32.mrb[61].mxu0 }
 0x2fd   : > { %v1538_v8 = vadd.f32 %v1537_v60, %v1536_v6  ;;  %v1539_v9 = vpop.f32.mrb[62].mxu0  ;;  %1280 = vadd.xlane.f32.xlu0 %v1252_v7  ;;  %v1253_v59 = vmul.f32 %v1971_v51, %v1230_v5 }
 0x2fe   : > { %v1540_v62 = vpop.f32.mrb[63].mxu0 }
 0x2ff   : > { %v1211_v10 = vadd.f32 %v1538_v8, %v1965_v47  ;;  %v1541_v11 = vadd.f32 %v1540_v62, %v1539_v9  ;;  %1282 = vadd.xlane.f32.xlu1 %v1253_v59 }
 0x301   : > { %v1231_v12 = vmax.f32 %v1211_v10, 0.0  ;;  %v1214_v13 = vadd.f32 %v1541_v11, %v1965_v47 }
 0x303   : > { %v1232_v14 = vmax.f32 %v1214_v13, 0.0  ;;  %v1254_v15 = vmul.f32 %v1971_v51, %v1231_v12 }
 0x305   : > { %1284 = vadd.xlane.f32.xlu0 %v1254_v15  ;;  %v1255_v16 = vmul.f32 %v1971_v51, %v1232_v14 }
 0x307   : > { %1286 = vadd.xlane.f32.xlu1 %v1255_v16 }
 0x35a   : > { %v1257_v47 = vpop.xlane.xlu0 %1256 }
 0x35b   : > { %v1295_v18 = vadd.f32 %v1475_v17, %v1257_v47 }
 0x35d   : > { %1312 = vst.msk [vmem:[%s2008_s20] sm:$0xff] %vm1311_vm1, %v1295_v18 }
 0x35e   : > { %v1259_v51 = vpop.xlane.xlu0 %1258 }
 0x35f   : > { %v1296_v19 = vadd.f32 %v1475_v17, %v1259_v51 }
 0x361   : > { %1313 = vst.msk [vmem:[%s2008_s20 + $0x8] sm:$0xff] %vm1311_vm1, %v1296_v19 }
 0x362   : > { %v1261_v20 = vpop.xlane.xlu1 %1260 }
 0x363   : > { %v1297_v21 = vadd.f32 %v1475_v17, %v1261_v20 }
 0x365   : > { %1314 = vst.msk [vmem:[%s2008_s20 + $0x10] sm:$0xff] %vm1311_vm1, %v1297_v21 }
 0x366   : > { %v1263_v22 = vpop.xlane.xlu1 %1262 }
 0x367   : > { %v1298_v23 = vadd.f32 %v1475_v17, %v1263_v22 }
 0x369   : > { %1315 = vst.msk [vmem:[%s2008_s20 + $0x18] sm:$0xff] %vm1311_vm1, %v1298_v23 }
 0x36a   : > { %v1265_v24 = vpop.xlane.xlu0 %1264 }
 0x36b   : > { %v1299_v25 = vadd.f32 %v1475_v17, %v1265_v24 }
 0x36c   : > { %v1267_v26 = vpop.xlane.xlu1 %1266 }
 0x36d   : > { %1316 = vst.msk [vmem:[%s2008_s20 + $0x20] sm:$0xff] %vm1311_vm1, %v1299_v25  ;;  %v1300_v27 = vadd.f32 %v1475_v17, %v1267_v26 }
 0x36f   : > { %1317 = vst.msk [vmem:[%s2008_s20 + $0x28] sm:$0xff] %vm1311_vm1, %v1300_v27 }
 0x372   : > { %v1269_v28 = vpop.xlane.xlu0 %1268 }
 0x373   : > { %v1301_v29 = vadd.f32 %v1475_v17, %v1269_v28 }
 0x374   : > { %v1271_v30 = vpop.xlane.xlu1 %1270 }
 0x375   : > { %1318 = vst.msk [vmem:[%s2008_s20 + $0x30] sm:$0xff] %vm1311_vm1, %v1301_v29  ;;  %v1302_v31 = vadd.f32 %v1475_v17, %v1271_v30 }
 0x377   : > { %1319 = vst.msk [vmem:[%s2008_s20 + $0x38] sm:$0xff] %vm1311_vm1, %v1302_v31 }
 0x37a   : > { %v1273_v32 = vpop.xlane.xlu0 %1272 }
 0x37b   : > { %v1303_v33 = vadd.f32 %v1475_v17, %v1273_v32 }
 0x37c   : > { %v1275_v34 = vpop.xlane.xlu1 %1274 }
 0x37d   : > { %1320 = vst.msk [vmem:[%s2008_s20 + $0x40] sm:$0xff] %vm1311_vm1, %v1303_v33  ;;  %v1304_v35 = vadd.f32 %v1475_v17, %v1275_v34 }
 0x37f   : > { %1321 = vst.msk [vmem:[%s2008_s20 + $0x48] sm:$0xff] %vm1311_vm1, %v1304_v35 }
 0x382   : > { %v1277_v36 = vpop.xlane.xlu0 %1276 }
 0x383   : > { %v1305_v37 = vadd.f32 %v1475_v17, %v1277_v36 }
 0x384   : > { %v1279_v38 = vpop.xlane.xlu1 %1278 }
 0x385   : > { %1322 = vst.msk [vmem:[%s2008_s20 + $0x50] sm:$0xff] %vm1311_vm1, %v1305_v37  ;;  %v1306_v39 = vadd.f32 %v1475_v17, %v1279_v38 }
 0x387   : > { %1323 = vst.msk [vmem:[%s2008_s20 + $0x58] sm:$0xff] %vm1311_vm1, %v1306_v39 }
 0x38a   : > { %v1281_v40 = vpop.xlane.xlu0 %1280 }
 0x38b   : > { %v1307_v41 = vadd.f32 %v1475_v17, %v1281_v40 }
 0x38c   : > { %v1283_v42 = vpop.xlane.xlu1 %1282 }
 0x38d   : > { %1324 = vst.msk [vmem:[%s2008_s20 + $0x60] sm:$0xff] %vm1311_vm1, %v1307_v41  ;;  %v1308_v43 = vadd.f32 %v1475_v17, %v1283_v42 }
 0x38f   : > { %1325 = vst.msk [vmem:[%s2008_s20 + $0x68] sm:$0xff] %vm1311_vm1, %v1308_v43 }
 0x392   : > { %v1285_v44 = vpop.xlane.xlu0 %1284 }
 0x393   : > { %v1309_v45 = vadd.f32 %v1475_v17, %v1285_v44 }
 0x394   : > { %v1287_v46 = vpop.xlane.xlu1 %1286 }
 0x395   : > { %1326 = vst.msk [vmem:[%s2008_s20 + $0x70] sm:$0xff] %vm1311_vm1, %v1309_v45  ;;  %v1310_v55 = vadd.f32 %v1475_v17, %v1287_v46 }
 0x397   : > { %1327 = vst.msk [vmem:[%s2008_s20 + $0x78] sm:$0xff] %vm1311_vm1, %v1310_v55 }
 0x398 PF: > { %s22_s11 = sadd.s32 1, %s1677_s11  }
 0x399   : > { %p19_p3 = scmp.ge.s32.totalorder %s22_s11, 4  }
 0x39b   :  { %21 = sbr.rel (!%p19_p3) target bundleno = 4 (0x4), region = 91 }
 0x3a2   :  { %1350 = vsyncpa [#allocation4], 1 }
 0x3a3   :  { %1352 = vsyncpa [#allocation4 + $0x1], 1 }

</bundles_post_ra>
